<compile_context>
chip_gen: v7x
topology: tpu7x:2x2x1
jax: 0.10.0
libtpu: 0.0.40
codegen_flags: <defaults>
</compile_context>

<pallas_src>
import jax
import jax.numpy as jnp
from jax.experimental import pallas as pl
from jax.experimental.pallas import tpu as pltpu

LANES = 128


def mlp_kernel(x_ref, w1_ref, b1_ref, w2_ref, b2_ref, w3_ref, b3_ref, o_ref):
    # x_ref: (F_in, S, 128) f32 in VMEM  -- batch packed over (sublane, lane).
    # w*_ref: (out, in) f32 in SMEM (torch nn.Linear layout); b*_ref: (out,) in SMEM.
    # o_ref: (F_out, S, 128) f32 in VMEM.
    f_in = x_ref.shape[0]
    rows = [x_ref[k].astype(jnp.float32) for k in range(f_in)]  # list of (S, 128)

    def dense(in_rows, w_ref, b_ref, activation):
        n_out, n_in = w_ref.shape
        out_rows = []
        for j in range(n_out):
            # scalar weight (SMEM) * dense (S,128) slab -> pure VPU broadcast-MAC
            acc = in_rows[0] * w_ref[j, 0]
            for k in range(1, n_in):
                acc = acc + in_rows[k] * w_ref[j, k]
            acc = acc + b_ref[j]
            out_rows.append(activation(acc))
        return out_rows

    relu = lambda v: jnp.maximum(v, 0.0)
    # sigmoid(z) = 1/(1+exp(-z)): exp on EUP, approx reciprocal also on the EUP
    # slot (separate from the VALU).  ~2e-4 abs error, irrelevant for inference.
    sigmoid = lambda v: pl.reciprocal(1.0 + jnp.exp(-v), approx=True)

    h1 = dense(rows, w1_ref, b1_ref, relu)   # hid1 + relu1
    h2 = dense(h1, w2_ref, b2_ref, relu)     # hid2 + relu2
    z = dense(h2, w3_ref, b3_ref, sigmoid)   # outp + sigmoid

    # Write each output row directly; no intermediate concat slab.
    for j in range(o_ref.shape[0]):
        o_ref[j] = z[j].astype(o_ref.dtype)


@jax.jit
def classification_net_forward(x, params):
    """x: (B, F_in) float32. Returns (B, F_out) float32 (same layout as torch)."""
    w1, b1, w2, b2, w3, b3 = params
    B, f_in = x.shape
    h1, h2, f_out = w1.shape[0], w2.shape[0], w3.shape[0]

    # Pack the batch over (sublane, lane): (B, F_in) -> (F_in, S, 128).
    b_pad = ((B + LANES - 1) // LANES) * LANES
    x_p = jnp.pad(x, ((0, b_pad - B), (0, 0))) if b_pad != B else x
    s = b_pad // LANES
    x_packed = x_p.reshape(s, LANES, f_in).transpose(2, 0, 1)

    flops = 2 * b_pad * (f_in * h1 + h1 * h2 + h2 * f_out)
    bytes_accessed = (b_pad * (f_in + f_out) + sum(p.size for p in params)) * 4

    smem = pl.BlockSpec(memory_space=pltpu.MemorySpace.SMEM)
    vmem = pl.BlockSpec(memory_space=pltpu.MemorySpace.VMEM)

    out_packed = pl.pallas_call(
        mlp_kernel,
        out_shape=jax.ShapeDtypeStruct((f_out, s, LANES), jnp.float32),
        in_specs=[vmem, smem, smem, smem, smem, smem, smem],
        out_specs=vmem,
        compiler_params=pltpu.CompilerParams(
            # Let XLA fuse the packing transpose of x into the kernel operand
            # instead of materializing a standalone copy kernel.
            allow_input_fusion=[True, False, False, False, False, False, False],
        ),
        cost_estimate=pl.CostEstimate(
            flops=flops, transcendentals=b_pad * f_out, bytes_accessed=bytes_accessed
        ),
    )(x_packed, w1, b1, w2, b2, w3, b3)

    # (F_out, S, 128) -> (B, F_out).  For f_out == 1 this is a pure reshape.
    out = out_packed.transpose(1, 2, 0).reshape(b_pad, f_out)
    return out[:B] if b_pad != B else out


def init_params(key, input_size=4, hidden=3, output_size=1):
    # Mimics torch.nn.Linear default init: U(-1/sqrt(fan_in), 1/sqrt(fan_in)).
    # Weights kept in torch (out, in) layout.
    ks = jax.random.split(key, 6)

    def linear(kw, kb, fan_in, fan_out):
        bound = 1.0 / jnp.sqrt(jnp.float32(fan_in))
        w = jax.random.uniform(kw, (fan_out, fan_in), jnp.float32, -bound, bound)
        b = jax.random.uniform(kb, (fan_out,), jnp.float32, -bound, bound)
        return w, b

    w1, b1 = linear(ks[0], ks[1], input_size, hidden)
    w2, b2 = linear(ks[2], ks[3], hidden, hidden)
    w3, b3 = linear(ks[4], ks[5], hidden, output_size)
    return (w1, b1, w2, b2, w3, b3)


def reference_forward(x, params):
    w1, b1, w2, b2, w3, b3 = params
    h1 = jnp.maximum(x @ w1.T + b1, 0.0)
    h2 = jnp.maximum(h1 @ w2.T + b2, 0.0)
    return jax.nn.sigmoid(h2 @ w3.T + b3)


if __name__ == "__main__":
    key = jax.random.PRNGKey(0)
    kx, kp = jax.random.split(key)

    # Matches torch spec: x = torch.rand(size=(256, 4)), ClassificationNet(4, 1)
    x = jax.random.uniform(kx, (256, 4), jnp.float32)
    params = init_params(kp, input_size=4, hidden=3, output_size=1)

    out = classification_net_forward(x, params)
    out = jax.block_until_ready(out)

    ref = reference_forward(x, params)
    assert out.shape == (256, 1)
    # Tolerance loosened slightly for the EUP approx-reciprocal in sigmoid.
    assert jnp.allclose(out, ref, atol=2e-3, rtol=2e-3), float(jnp.max(jnp.abs(out - ref)))

    print("KERNEL_OK")
</pallas_src>

<mosaic_0001>
module attributes {stable_mosaic.version = 11 : i64} {
  func.func @mlp_kernel(%arg0: memref<4x2x128xf32, #tpu.memory_space<vmem>>, %arg1: memref<3x4xf32, #tpu.memory_space<smem>>, %arg2: memref<3xf32, #tpu.memory_space<smem>>, %arg3: memref<3x3xf32, #tpu.memory_space<smem>>, %arg4: memref<3xf32, #tpu.memory_space<smem>>, %arg5: memref<1x3xf32, #tpu.memory_space<smem>>, %arg6: memref<1xf32, #tpu.memory_space<smem>>, %arg7: memref<1x2x128xf32, #tpu.memory_space<vmem>>) attributes {dimension_semantics = [], scalar_prefetch = 0 : i64, scratch_operands = 0 : i64, tpu.core_type = #tpu.core_type<tc>} {
    %c0 = arith.constant 0 : index
    %c0_0 = arith.constant 0 : index
    %c0_1 = arith.constant 0 : index
    %0 = vector.load %arg0[%c0, %c0_0, %c0_1] : memref<4x2x128xf32, #tpu.memory_space<vmem>>, vector<1x2x128xf32>
    %1 = vector.shape_cast %0 : vector<1x2x128xf32> to vector<2x128xf32>
    %c1 = arith.constant 1 : index
    %c0_2 = arith.constant 0 : index
    %c0_3 = arith.constant 0 : index
    %2 = vector.load %arg0[%c1, %c0_2, %c0_3] : memref<4x2x128xf32, #tpu.memory_space<vmem>>, vector<1x2x128xf32>
    %3 = vector.shape_cast %2 : vector<1x2x128xf32> to vector<2x128xf32>
    %c2 = arith.constant 2 : index
    %c0_4 = arith.constant 0 : index
    %c0_5 = arith.constant 0 : index
    %4 = vector.load %arg0[%c2, %c0_4, %c0_5] : memref<4x2x128xf32, #tpu.memory_space<vmem>>, vector<1x2x128xf32>
    %5 = vector.shape_cast %4 : vector<1x2x128xf32> to vector<2x128xf32>
    %c3 = arith.constant 3 : index
    %c0_6 = arith.constant 0 : index
    %c0_7 = arith.constant 0 : index
    %6 = vector.load %arg0[%c3, %c0_6, %c0_7] : memref<4x2x128xf32, #tpu.memory_space<vmem>>, vector<1x2x128xf32>
    %7 = vector.shape_cast %6 : vector<1x2x128xf32> to vector<2x128xf32>
    %c0_8 = arith.constant 0 : index
    %c0_9 = arith.constant 0 : index
    %8 = memref.load %arg1[%c0_8, %c0_9] : memref<3x4xf32, #tpu.memory_space<smem>>
    %9 = vector.broadcast %8 : f32 to vector<2x128xf32>
    %10 = arith.mulf %1, %9 : vector<2x128xf32>
    %c0_10 = arith.constant 0 : index
    %c1_11 = arith.constant 1 : index
    %11 = memref.load %arg1[%c0_10, %c1_11] : memref<3x4xf32, #tpu.memory_space<smem>>
    %12 = vector.broadcast %11 : f32 to vector<2x128xf32>
    %13 = arith.mulf %3, %12 : vector<2x128xf32>
    %14 = arith.addf %10, %13 : vector<2x128xf32>
    %c0_12 = arith.constant 0 : index
    %c2_13 = arith.constant 2 : index
    %15 = memref.load %arg1[%c0_12, %c2_13] : memref<3x4xf32, #tpu.memory_space<smem>>
    %16 = vector.broadcast %15 : f32 to vector<2x128xf32>
    %17 = arith.mulf %5, %16 : vector<2x128xf32>
    %18 = arith.addf %14, %17 : vector<2x128xf32>
    %c0_14 = arith.constant 0 : index
    %c3_15 = arith.constant 3 : index
    %19 = memref.load %arg1[%c0_14, %c3_15] : memref<3x4xf32, #tpu.memory_space<smem>>
    %20 = vector.broadcast %19 : f32 to vector<2x128xf32>
    %21 = arith.mulf %7, %20 : vector<2x128xf32>
    %22 = arith.addf %18, %21 : vector<2x128xf32>
    %c0_16 = arith.constant 0 : index
    %23 = memref.load %arg2[%c0_16] : memref<3xf32, #tpu.memory_space<smem>>
    %24 = vector.broadcast %23 : f32 to vector<2x128xf32>
    %25 = arith.addf %22, %24 : vector<2x128xf32>
    %cst = arith.constant 0.000000e+00 : f32
    %26 = vector.broadcast %cst : f32 to vector<2x128xf32>
    %27 = arith.maximumf %25, %26 : vector<2x128xf32>
    %c1_17 = arith.constant 1 : index
    %c0_18 = arith.constant 0 : index
    %28 = memref.load %arg1[%c1_17, %c0_18] : memref<3x4xf32, #tpu.memory_space<smem>>
    %29 = vector.broadcast %28 : f32 to vector<2x128xf32>
    %30 = arith.mulf %1, %29 : vector<2x128xf32>
    %c1_19 = arith.constant 1 : index
    %c1_20 = arith.constant 1 : index
    %31 = memref.load %arg1[%c1_19, %c1_20] : memref<3x4xf32, #tpu.memory_space<smem>>
    %32 = vector.broadcast %31 : f32 to vector<2x128xf32>
    %33 = arith.mulf %3, %32 : vector<2x128xf32>
    %34 = arith.addf %30, %33 : vector<2x128xf32>
    %c1_21 = arith.constant 1 : index
    %c2_22 = arith.constant 2 : index
    %35 = memref.load %arg1[%c1_21, %c2_22] : memref<3x4xf32, #tpu.memory_space<smem>>
    %36 = vector.broadcast %35 : f32 to vector<2x128xf32>
    %37 = arith.mulf %5, %36 : vector<2x128xf32>
    %38 = arith.addf %34, %37 : vector<2x128xf32>
    %c1_23 = arith.constant 1 : index
    %c3_24 = arith.constant 3 : index
    %39 = memref.load %arg1[%c1_23, %c3_24] : memref<3x4xf32, #tpu.memory_space<smem>>
    %40 = vector.broadcast %39 : f32 to vector<2x128xf32>
    %41 = arith.mulf %7, %40 : vector<2x128xf32>
    %42 = arith.addf %38, %41 : vector<2x128xf32>
    %c1_25 = arith.constant 1 : index
    %43 = memref.load %arg2[%c1_25] : memref<3xf32, #tpu.memory_space<smem>>
    %44 = vector.broadcast %43 : f32 to vector<2x128xf32>
    %45 = arith.addf %42, %44 : vector<2x128xf32>
    %cst_26 = arith.constant 0.000000e+00 : f32
    %46 = vector.broadcast %cst_26 : f32 to vector<2x128xf32>
    %47 = arith.maximumf %45, %46 : vector<2x128xf32>
    %c2_27 = arith.constant 2 : index
    %c0_28 = arith.constant 0 : index
    %48 = memref.load %arg1[%c2_27, %c0_28] : memref<3x4xf32, #tpu.memory_space<smem>>
    %49 = vector.broadcast %48 : f32 to vector<2x128xf32>
    %50 = arith.mulf %1, %49 : vector<2x128xf32>
    %c2_29 = arith.constant 2 : index
    %c1_30 = arith.constant 1 : index
    %51 = memref.load %arg1[%c2_29, %c1_30] : memref<3x4xf32, #tpu.memory_space<smem>>
    %52 = vector.broadcast %51 : f32 to vector<2x128xf32>
    %53 = arith.mulf %3, %52 : vector<2x128xf32>
    %54 = arith.addf %50, %53 : vector<2x128xf32>
    %c2_31 = arith.constant 2 : index
    %c2_32 = arith.constant 2 : index
    %55 = memref.load %arg1[%c2_31, %c2_32] : memref<3x4xf32, #tpu.memory_space<smem>>
    %56 = vector.broadcast %55 : f32 to vector<2x128xf32>
    %57 = arith.mulf %5, %56 : vector<2x128xf32>
    %58 = arith.addf %54, %57 : vector<2x128xf32>
    %c2_33 = arith.constant 2 : index
    %c3_34 = arith.constant 3 : index
    %59 = memref.load %arg1[%c2_33, %c3_34] : memref<3x4xf32, #tpu.memory_space<smem>>
    %60 = vector.broadcast %59 : f32 to vector<2x128xf32>
    %61 = arith.mulf %7, %60 : vector<2x128xf32>
    %62 = arith.addf %58, %61 : vector<2x128xf32>
    %c2_35 = arith.constant 2 : index
    %63 = memref.load %arg2[%c2_35] : memref<3xf32, #tpu.memory_space<smem>>
    %64 = vector.broadcast %63 : f32 to vector<2x128xf32>
    %65 = arith.addf %62, %64 : vector<2x128xf32>
    %cst_36 = arith.constant 0.000000e+00 : f32
    %66 = vector.broadcast %cst_36 : f32 to vector<2x128xf32>
    %67 = arith.maximumf %65, %66 : vector<2x128xf32>
    %c0_37 = arith.constant 0 : index
    %c0_38 = arith.constant 0 : index
    %68 = memref.load %arg3[%c0_37, %c0_38] : memref<3x3xf32, #tpu.memory_space<smem>>
    %69 = vector.broadcast %68 : f32 to vector<2x128xf32>
    %70 = arith.mulf %27, %69 : vector<2x128xf32>
    %c0_39 = arith.constant 0 : index
    %c1_40 = arith.constant 1 : index
    %71 = memref.load %arg3[%c0_39, %c1_40] : memref<3x3xf32, #tpu.memory_space<smem>>
    %72 = vector.broadcast %71 : f32 to vector<2x128xf32>
    %73 = arith.mulf %47, %72 : vector<2x128xf32>
    %74 = arith.addf %70, %73 : vector<2x128xf32>
    %c0_41 = arith.constant 0 : index
    %c2_42 = arith.constant 2 : index
    %75 = memref.load %arg3[%c0_41, %c2_42] : memref<3x3xf32, #tpu.memory_space<smem>>
    %76 = vector.broadcast %75 : f32 to vector<2x128xf32>
    %77 = arith.mulf %67, %76 : vector<2x128xf32>
    %78 = arith.addf %74, %77 : vector<2x128xf32>
    %c0_43 = arith.constant 0 : index
    %79 = memref.load %arg4[%c0_43] : memref<3xf32, #tpu.memory_space<smem>>
    %80 = vector.broadcast %79 : f32 to vector<2x128xf32>
    %81 = arith.addf %78, %80 : vector<2x128xf32>
    %cst_44 = arith.constant 0.000000e+00 : f32
    %82 = vector.broadcast %cst_44 : f32 to vector<2x128xf32>
    %83 = arith.maximumf %81, %82 : vector<2x128xf32>
    %c1_45 = arith.constant 1 : index
    %c0_46 = arith.constant 0 : index
    %84 = memref.load %arg3[%c1_45, %c0_46] : memref<3x3xf32, #tpu.memory_space<smem>>
    %85 = vector.broadcast %84 : f32 to vector<2x128xf32>
    %86 = arith.mulf %27, %85 : vector<2x128xf32>
    %c1_47 = arith.constant 1 : index
    %c1_48 = arith.constant 1 : index
    %87 = memref.load %arg3[%c1_47, %c1_48] : memref<3x3xf32, #tpu.memory_space<smem>>
    %88 = vector.broadcast %87 : f32 to vector<2x128xf32>
    %89 = arith.mulf %47, %88 : vector<2x128xf32>
    %90 = arith.addf %86, %89 : vector<2x128xf32>
    %c1_49 = arith.constant 1 : index
    %c2_50 = arith.constant 2 : index
    %91 = memref.load %arg3[%c1_49, %c2_50] : memref<3x3xf32, #tpu.memory_space<smem>>
    %92 = vector.broadcast %91 : f32 to vector<2x128xf32>
    %93 = arith.mulf %67, %92 : vector<2x128xf32>
    %94 = arith.addf %90, %93 : vector<2x128xf32>
    %c1_51 = arith.constant 1 : index
    %95 = memref.load %arg4[%c1_51] : memref<3xf32, #tpu.memory_space<smem>>
    %96 = vector.broadcast %95 : f32 to vector<2x128xf32>
    %97 = arith.addf %94, %96 : vector<2x128xf32>
    %cst_52 = arith.constant 0.000000e+00 : f32
    %98 = vector.broadcast %cst_52 : f32 to vector<2x128xf32>
    %99 = arith.maximumf %97, %98 : vector<2x128xf32>
    %c2_53 = arith.constant 2 : index
    %c0_54 = arith.constant 0 : index
    %100 = memref.load %arg3[%c2_53, %c0_54] : memref<3x3xf32, #tpu.memory_space<smem>>
    %101 = vector.broadcast %100 : f32 to vector<2x128xf32>
    %102 = arith.mulf %27, %101 : vector<2x128xf32>
    %c2_55 = arith.constant 2 : index
    %c1_56 = arith.constant 1 : index
    %103 = memref.load %arg3[%c2_55, %c1_56] : memref<3x3xf32, #tpu.memory_space<smem>>
    %104 = vector.broadcast %103 : f32 to vector<2x128xf32>
    %105 = arith.mulf %47, %104 : vector<2x128xf32>
    %106 = arith.addf %102, %105 : vector<2x128xf32>
    %c2_57 = arith.constant 2 : index
    %c2_58 = arith.constant 2 : index
    %107 = memref.load %arg3[%c2_57, %c2_58] : memref<3x3xf32, #tpu.memory_space<smem>>
    %108 = vector.broadcast %107 : f32 to vector<2x128xf32>
    %109 = arith.mulf %67, %108 : vector<2x128xf32>
    %110 = arith.addf %106, %109 : vector<2x128xf32>
    %c2_59 = arith.constant 2 : index
    %111 = memref.load %arg4[%c2_59] : memref<3xf32, #tpu.memory_space<smem>>
    %112 = vector.broadcast %111 : f32 to vector<2x128xf32>
    %113 = arith.addf %110, %112 : vector<2x128xf32>
    %cst_60 = arith.constant 0.000000e+00 : f32
    %114 = vector.broadcast %cst_60 : f32 to vector<2x128xf32>
    %115 = arith.maximumf %113, %114 : vector<2x128xf32>
    %c0_61 = arith.constant 0 : index
    %c0_62 = arith.constant 0 : index
    %116 = memref.load %arg5[%c0_61, %c0_62] : memref<1x3xf32, #tpu.memory_space<smem>>
    %117 = vector.broadcast %116 : f32 to vector<2x128xf32>
    %118 = arith.mulf %83, %117 : vector<2x128xf32>
    %c0_63 = arith.constant 0 : index
    %c1_64 = arith.constant 1 : index
    %119 = memref.load %arg5[%c0_63, %c1_64] : memref<1x3xf32, #tpu.memory_space<smem>>
    %120 = vector.broadcast %119 : f32 to vector<2x128xf32>
    %121 = arith.mulf %99, %120 : vector<2x128xf32>
    %122 = arith.addf %118, %121 : vector<2x128xf32>
    %c0_65 = arith.constant 0 : index
    %c2_66 = arith.constant 2 : index
    %123 = memref.load %arg5[%c0_65, %c2_66] : memref<1x3xf32, #tpu.memory_space<smem>>
    %124 = vector.broadcast %123 : f32 to vector<2x128xf32>
    %125 = arith.mulf %115, %124 : vector<2x128xf32>
    %126 = arith.addf %122, %125 : vector<2x128xf32>
    %c0_67 = arith.constant 0 : index
    %127 = memref.load %arg6[%c0_67] : memref<1xf32, #tpu.memory_space<smem>>
    %128 = vector.broadcast %127 : f32 to vector<2x128xf32>
    %129 = arith.addf %126, %128 : vector<2x128xf32>
    %cst_68 = arith.constant 0.000000e+00 : f32
    %130 = vector.broadcast %cst_68 : f32 to vector<2x128xf32>
    %131 = arith.subf %130, %129 : vector<2x128xf32>
    %132 = math.exp %131 : vector<2x128xf32>
    %cst_69 = arith.constant 1.000000e+00 : f32
    %133 = vector.broadcast %cst_69 : f32 to vector<2x128xf32>
    %134 = arith.addf %133, %132 : vector<2x128xf32>
    %135 = tpu.reciprocal %134 {approx = true} : vector<2x128xf32> -> vector<2x128xf32>
    %c0_70 = arith.constant 0 : index
    %c0_71 = arith.constant 0 : index
    %c0_72 = arith.constant 0 : index
    %136 = vector.load %arg7[%c0_70, %c0_71, %c0_72] : memref<1x2x128xf32, #tpu.memory_space<vmem>>, vector<1x2x128xf32>
    %137 = vector.shape_cast %136 : vector<1x2x128xf32> to vector<2x128xf32>
    %138 = vector.shape_cast %135 : vector<2x128xf32> to vector<1x2x128xf32>
    tpu.vector_store %arg7[%c0_70, %c0_71, %c0_72], %138 {strides = array<i32>} : memref<1x2x128xf32, #tpu.memory_space<vmem>>, vector<1x2x128xf32>,
    return
  }
}

</mosaic_0001>

<bundles_post_ra>
// kernel: classification_net_forward.2
= control target key start
LH: loop header
LB: loop body
LE: loop exit
PB: predicated region body
PF: predicated region fallthrough
CT: control target
= control target key end

     0   :  { %13 = vsyncpa [#allocation5], 0  ;;  %s518_s0 = inlined_call_operand.vmem [shape: f32[3,4], index: 0, kind: input, shape index: {}]   ;;  %s519_s1 = inlined_call_operand.vmem [shape: f32[3], index: 1, kind: input, shape index: {}]   ;;  %s520_s2 = inlined_call_operand.vmem [shape: f32[3,3], index: 2, kind: input, shape index: {}]   ;;  %s521_s3 = inlined_call_operand.vmem [shape: f32[3], index: 3, kind: input, shape index: {}]   ;;  %s522_s4 = inlined_call_operand.vmem [shape: f32[1,3], index: 4, kind: input, shape index: {}]   ;;  %s523_s5 = inlined_call_operand.<no memory space> [shape: f32[1], index: 5, kind: input, shape index: {}]   ;;  %s524_s6 = inlined_call_operand.vmem [shape: f32[2,128,4], index: 6, kind: input, shape index: {}]   ;;  %s525_s7 = inlined_call_operand.hbm [shape: f32[1,2,128], index: 7, kind: output, shape index: {}]  }
   0x1   :  { %14 = vsyncpa [#allocation7], 0 }
   0x2   :  { %15 = vsyncpa [#allocation10], 0  ;;  %s35_s26 = sshll.u32 %s519_s1, 4  ;;  %s36_s26 = int_to_ptr.vmem [resolvable:$true] %s35_s26 }
   0x3   :  { %16 = vsyncpa [#allocation4], 0  ;;  %s55_s29 = sshll.u32 %s521_s3, 4  ;;  %s289_s30 = scalar_lea.vmem %s36_s26, 16  ;;  %s56_s29 = int_to_ptr.vmem [resolvable:$true] %s55_s29 }
   0x4   :  { %p290_p0 = scmp.ne.s32.totalorder %s36_s26, %s289_s30  ;;  %p294_p1 = scmp.lt.s32.totalorder %s36_s26, %s36_s26 }
   0x5   :  { %p295_p2 = scmp.lt.s32.totalorder %s289_s30, %s289_s30 }
   0x7   :  { %p296_p3 = por %p295_p2, %p294_p1 }
   0x9   :  { %p297_p4 = pnand %p296_p3, %p290_p0 }
   0xb   :  { %300 = shalt.err (!%p297_p4)
}
   0xc   :  { %s379_s8 = smov [#allocation6]   ;;  %s301_s9 = scalar_lea.vmem %s56_s29, 16 }
   0xd   :  { %38 = dma.vmem_to_smem %s36_s26, 16, %s379_s8, [#allocation7]  }
   0xe   :  { %p302_p5 = scmp.ne.s32.totalorder %s56_s29, %s301_s9  ;;  %p306_p6 = scmp.lt.s32.totalorder %s56_s29, %s56_s29 }
   0xf   :  { %p307_p7 = scmp.lt.s32.totalorder %s301_s9, %s301_s9 }
  0x11   :  { %p308_p8 = por %p307_p7, %p306_p6 }
  0x13   :  { %p309_p9 = pnand %p308_p8, %p302_p5 }
  0x15   :  { %312 = shalt.err (!%p309_p9)
}
  0x16   :  { %s380_s1 = smov [#allocation9]   ;;  %s25_s11 = sshll.u32 %s518_s0, 4  ;;  %s26_s11 = int_to_ptr.vmem [resolvable:$true] %s25_s11 }
  0x17   :  { %58 = dma.vmem_to_smem %s56_s29, 16, %s380_s1, [#allocation10]  }
  0x18   :  { %s45_s14 = sshll.u32 %s520_s2, 4  ;;  %s313_s15 = scalar_lea.vmem %s26_s11, 64  ;;  %s46_s14 = int_to_ptr.vmem [resolvable:$true] %s45_s14 }
  0x19   :  { %p314_p10 = scmp.ne.s32.totalorder %s26_s11, %s313_s15  ;;  %p318_p11 = scmp.lt.s32.totalorder %s26_s11, %s26_s11 }
  0x1a   :  { %p319_p12 = scmp.lt.s32.totalorder %s313_s15, %s313_s15 }
  0x1c   :  { %p320_p13 = por %p319_p12, %p318_p11 }
  0x1e   :  { %p321_p0 = pnand %p320_p13, %p314_p10 }
  0x20   :  { %324 = shalt.err (!%p321_p0)
}
  0x21   :  { %s381_s16 = smov [#allocation3]   ;;  %s325_s17 = scalar_lea.vmem %s46_s14, 64 }
  0x22   :  { %28 = dma.vmem_to_smem %s26_s11, 64, %s381_s16, [#allocation5]  }
  0x23   :  { %p326_p1 = scmp.ne.s32.totalorder %s46_s14, %s325_s17  ;;  %p330_p2 = scmp.lt.s32.totalorder %s46_s14, %s46_s14 }
  0x24   :  { %p331_p3 = scmp.lt.s32.totalorder %s325_s17, %s325_s17 }
  0x26   :  { %p332_p4 = por %p331_p3, %p330_p2 }
  0x28   :  { %p333_p5 = pnand %p332_p4, %p326_p1 }
  0x2a   :  { %336 = shalt.err (!%p333_p5)
}
  0x2b   :  { %s382_s0 = smov [#allocation8]   ;;  %s65_s19 = sshll.u32 %s522_s4, 4  ;;  %s66_s19 = int_to_ptr.vmem [resolvable:$true] %s65_s19 }
  0x2c   :  { %48 = dma.vmem_to_smem %s46_s14, 64, %s382_s0, [#allocation7]  }
  0x2d   :  { %s337_s20 = scalar_lea.vmem %s66_s19, 16  ;;  %p342_p7 = scmp.lt.s32.totalorder %s66_s19, %s66_s19 }
  0x2e   :  { %p338_p6 = scmp.ne.s32.totalorder %s66_s19, %s337_s20  ;;  %p343_p8 = scmp.lt.s32.totalorder %s337_s20, %s337_s20 }
  0x30   :  { %p344_p9 = por %p343_p8, %p342_p7 }
  0x32   :  { %p345_p10 = pnand %p344_p9, %p338_p6 }
  0x34   :  { %348 = shalt.err (!%p345_p10)
}
  0x35   :  { %s383_s21 = smov [#allocation11]  }
  0x36   :  { %68 = dma.vmem_to_smem %s66_s19, 16, %s383_s21, [#allocation10]  }
  0x37   :  { %371 = dma.done.wait [#allocation5], 64  }
  0x38   :  { %372 = vsyncadd [#allocation5], 4294967232 }
  0x39   :  { %373 = dma.done.wait [#allocation7], 80  }
  0x3a   :  { %374 = vsyncadd [#allocation7], 4294967216 }
  0x3b   :  { %375 = dma.done.wait [#allocation10], 32  }
  0x3c   :  { %376 = vsyncadd [#allocation10], 4294967264 }
  0x3d   :  { %86 = sfence }
  0x3e   :  { %v87_v0 = vld [vmem:[%s524_s6] sm:$0xff]   ;;  %s112_s4 = sld [smem:[#allocation3]]  ;;  %s254_s24 = sld [smem:[#allocation3 + $0x1]] }
  0x3f   :  { %89 = vst [vmem:[#allocation13] sm:$0xff] %v87_v0   ;;  %s255_s25 = sld [smem:[#allocation3 + $0x2]]  ;;  %s443_s26 = sld [smem:[#allocation3 + $0x3]] }
  0x40   :  { %s257_s27 = sld [smem:[#allocation3 + $0x80]]  ;;  %s258_s28 = sld [smem:[#allocation3 + $0x81]] }
  0x41   :  { %s259_s29 = sld [smem:[#allocation3 + $0x82]]  ;;  %s445_s30 = sld [smem:[#allocation6]] }
  0x42   :  { %s260_s8 = sld [smem:[#allocation3 + $0x83]]  ;;  %s447_s9 = sld [smem:[#allocation3 + $0x100]] }
  0x43   :  { %s449_s1 = sld [smem:[#allocation3 + $0x101]]  ;;  %s451_s6 = sld [smem:[#allocation3 + $0x102]] }
  0x44   :  { %v113_v1 = vstv %s112_s4  ;;  %v116_v2 = vstv %s254_s24  ;;  %s453_s3 = sld [smem:[#allocation3 + $0x103]]  ;;  %s455_s10 = sld [smem:[#allocation6 + $0x1]] }
  0x45   :  { %v120_v3 = vstv %s255_s25  ;;  %v124_v7 = vstv %s443_s26  ;;  %s458_s11 = sld [smem:[#allocation6 + $0x2]]  ;;  %s460_s12 = sld [smem:[#allocation8]] }
  0x46   :  { %v105_v4 = vld [vmem:[#allocation13] sm:$0x3]  ;;  %v107_v5 = vld [vmem:[#allocation13 + $0x2] sm:$0x3]  ;;  %v109_v6 = vld [vmem:[#allocation13 + $0x4] sm:$0x3]  ;;  %v132_v8 = vstv %s257_s27  ;;  %v135_v14 = vstv %s258_s28 }
  0x47   :  { %v111_v9 = vld [vmem:[#allocation13 + $0x6] sm:$0x3]  ;;  %v114_v10 = vmul.f32 %v113_v1, %v105_v4  ;;  %v117_v11 = vmul.f32 %v116_v2, %v107_v5  ;;  %v121_v12 = vmul.f32 %v120_v3, %v109_v6  ;;  %v133_v13 = vmul.f32 %v132_v8, %v105_v4  ;;  %s462_s13 = sld [smem:[#allocation8 + $0x80]]  ;;  %s464_s14 = sld [smem:[#allocation8 + $0x1]] }
  0x48   :  { %v139_v15 = vstv %s259_s29  ;;  %v143_v16 = vstv %s260_s8  ;;  %v125_v18 = vmul.f32 %v124_v7, %v111_v9  ;;  %v136_v19 = vmul.f32 %v135_v14, %v107_v5  ;;  %s469_s15 = sld [smem:[#allocation8 + $0x81]]  ;;  %s471_s16 = sld [smem:[#allocation8 + $0x100]] }
  0x49   :  { %v118_v17 = vadd.f32 %v117_v11, %v114_v10  ;;  %v140_v20 = vmul.f32 %v139_v15, %v109_v6  ;;  %v144_v21 = vmul.f32 %v143_v16, %v111_v9  ;;  %v151_v22 = vstv %s447_s9  ;;  %s473_s17 = sld [smem:[#allocation8 + $0x2]]  ;;  %s475_s0 = sld [smem:[#allocation8 + $0x101]] }
  0x4a   :  { %v154_v23 = vstv %s449_s1  ;;  %v158_v24 = vstv %s451_s6  ;;  %v137_v26 = vadd.f32 %v136_v19, %v133_v13  ;;  %v152_v27 = vmul.f32 %v151_v22, %v105_v4  ;;  %s479_s2 = sld [smem:[#allocation8 + $0x82]]  ;;  %s486_s19 = sld [smem:[#allocation9]] }
  0x4b   :  { %v122_v25 = vadd.f32 %v121_v12, %v118_v17  ;;  %v155_v28 = vmul.f32 %v154_v23, %v107_v5  ;;  %v128_v29 = vstv %s445_s30  ;;  %v159_v30 = vmul.f32 %v158_v24, %v109_v6  ;;  %s481_s18 = sld [smem:[#allocation8 + $0x102]]  ;;  %s489_s20 = sld [smem:[#allocation9 + $0x1]] }
  0x4c   :  { %v162_v31 = vstv %s453_s3  ;;  %v141_v33 = vadd.f32 %v140_v20, %v137_v26  ;;  %v147_v36 = vstv %s455_s10  ;;  %v166_v40 = vstv %s458_s11  ;;  %s492_s21 = sld [smem:[#allocation9 + $0x2]]  ;;  %s214_s22 = sld [smem:[#allocation11]] }
  0x4d   :  { %v126_v32 = vadd.f32 %v125_v18, %v122_v25  ;;  %v156_v34 = vadd.f32 %v155_v28, %v152_v27  ;;  %v163_v35 = vmul.f32 %v162_v31, %v111_v9  ;;  %v170_v41 = vstv %s460_s12  ;;  %s277_s23 = sld [smem:[#allocation11 + $0x1]]  ;;  %s278_s4 = sld [smem:[#allocation11 + $0x2]] }
  0x4e   :  { %v145_v38 = vadd.f32 %v144_v21, %v141_v33  ;;  %v185_v42 = vstv %s462_s13  ;;  %v200_v46 = vstv %s471_s16  ;;  %v173_v47 = vstv %s464_s14  ;;  %s384_s26 = smov [#allocation12]  }
  0x4f   :  { %v129_v37 = vadd.f32 %v128_v29, %v126_v32  ;;  %v160_v39 = vadd.f32 %v159_v30, %v156_v34  ;;  %v188_v48 = vstv %s469_s15  ;;  %v203_v49 = vstv %s475_s0  ;;  %s240_s27 = sshll.u32 %s384_s26, 4  ;;  %s241_s27 = int_to_ptr.vmem [resolvable:$true] %s240_s27 }
  0x50   :  { %v148_v44 = vadd.f32 %v147_v36, %v145_v38  ;;  %v177_v54 = vstv %s473_s17  ;;  %v192_v55 = vstv %s479_s2  ;;  %v181_v2 = vstv %s486_s19  ;;  %s349_s28 = scalar_lea.vmem %s241_s27, 32  ;;  %p354_p12 = scmp.lt.s32.totalorder %s241_s27, %s241_s27 }
  0x51   :  { %v130_v43 = vmax.f32 %v129_v37, 0.0  ;;  %v164_v45 = vadd.f32 %v163_v35, %v160_v39  ;;  %v207_v57 = vstv %s481_s18  ;;  %v196_v3 = vstv %s489_s20  ;;  %p350_p11 = scmp.ne.s32.totalorder %s241_s27, %s349_s28  ;;  %p355_p13 = scmp.lt.s32.totalorder %s349_s28, %s349_s28 }
  0x52   :  { %v149_v50 = vmax.f32 %v148_v44, 0.0  ;;  %v211_v8 = vstv %s492_s21  ;;  %v215_v13 = vstv %s214_s22  ;;  %v226_v23 = vstv %s523_s5 }
  0x53   :  { %v167_v51 = vadd.f32 %v166_v40, %v164_v45  ;;  %v171_v52 = vmul.f32 %v170_v41, %v130_v43  ;;  %v186_v53 = vmul.f32 %v185_v42, %v130_v43  ;;  %v201_v56 = vmul.f32 %v200_v46, %v130_v43  ;;  %p356_p0 = por %p355_p13, %p354_p12 }
  0x54   :  { %v174_v59 = vmul.f32 %v173_v47, %v149_v50  ;;  %v189_v60 = vmul.f32 %v188_v48, %v149_v50  ;;  %v204_v61 = vmul.f32 %v203_v49, %v149_v50  ;;  %v218_v14 = vstv %s277_s23 }
  0x55   :  { %v168_v58 = vmax.f32 %v167_v51, 0.0  ;;  %v222_v17 = vstv %s278_s4  ;;  %p357_p1 = pnand %p356_p0, %p350_p11 }
  0x56   :  { %v175_v62 = vadd.f32 %v174_v59, %v171_v52  ;;  %v190_v0 = vadd.f32 %v189_v60, %v186_v53  ;;  %v205_v4 = vadd.f32 %v204_v61, %v201_v56 }
  0x57   :  { %v178_v63 = vmul.f32 %v177_v54, %v168_v58  ;;  %v193_v1 = vmul.f32 %v192_v55, %v168_v58  ;;  %v208_v5 = vmul.f32 %v207_v57, %v168_v58 }
  0x59   :  { %v179_v6 = vadd.f32 %v178_v63, %v175_v62  ;;  %v194_v7 = vadd.f32 %v193_v1, %v190_v0  ;;  %v209_v9 = vadd.f32 %v208_v5, %v205_v4 }
  0x5b   :  { %v182_v10 = vadd.f32 %v181_v2, %v179_v6  ;;  %v197_v11 = vadd.f32 %v196_v3, %v194_v7  ;;  %v212_v12 = vadd.f32 %v211_v8, %v209_v9 }
  0x5d   :  { %v183_v15 = vmax.f32 %v182_v10, 0.0  ;;  %v198_v16 = vmax.f32 %v197_v11, 0.0  ;;  %v213_v18 = vmax.f32 %v212_v12, 0.0 }
  0x5f   :  { %v216_v19 = vmul.f32 %v215_v13, %v183_v15  ;;  %v219_v20 = vmul.f32 %v218_v14, %v198_v16  ;;  %v223_v21 = vmul.f32 %v222_v17, %v213_v18 }
  0x61   :  { %v220_v22 = vadd.f32 %v219_v20, %v216_v19 }
  0x63   :  { %v224_v24 = vadd.f32 %v223_v21, %v220_v22 }
  0x65   :  { %v227_v25 = vadd.f32 %v226_v23, %v224_v24 }
  0x67   :  { %v228_v26 = vsub.f32 0.0, %v227_v25 }
  0x69   :  { %v229_v27 = vmul.f32 1.442695, %v228_v26 }
  0x6b   :  { %285 = vpow2.f32 %v229_v27 }
  0x75   :  { %v286_v28 = vpop.eup %285 }
  0x76   :  { %v231_v29 = vadd.f32 1.0, %v286_v28 }
  0x78   :  { %287 = vrcp.f32 %v231_v29 }
  0x82   :  { %v288_v30 = vpop.eup %287 }
  0x83   :  { %233 = vst [vmem:[#allocation12] sm:$0x3] %v288_v30 }
  0x84   :  { %360 = shalt.err (!%p357_p1)
}
  0x85   :  { %s361_s30 = scalar_lea.hbm %s525_s7, 32 }
  0x86   :  { %p362_p2 = scmp.ne.s32.totalorder %s525_s7, %s361_s30  ;;  %p365_p3 = scmp.lt.u32.totalorder %s361_s30, %s525_s7 }
  0x88   :  { %p367_p4 = pnand %p365_p3, %p362_p2 }
  0x8a   :  { %370 = shalt.err (!%p367_p4)
}
  0x8b   :  { %243 = dma.vmem_to_hbm [thread:$0]  %s241_s27, 32, %s525_s7, [#allocation4]  }
  0x8c   :  { %377 = dma.done.wait [#allocation4], 32  }
  0x8d   :  { %378 = vsyncadd [#allocation4], 4294967264 }
  0x8e   :  { %247 = vsyncpa [#allocation4], 1 }
  0x8f   :  { %248 = vsyncpa [#allocation5], 1 }
  0x90   :  { %249 = vsyncpa [#allocation7], 1 }
  0x91   :  { %250 = vsyncpa [#allocation10], 1 }

</bundles_post_ra>
